<compile_context>
chip_gen: v5e
topology: v5e:2x2
jax: 0.10.0
libtpu: 0.0.40
codegen_flags: <defaults>
</compile_context>

<pallas_src>
import functools
import math

import jax
import jax.numpy as jnp
from jax import lax
from jax.experimental import pallas as pl
from jax.experimental.pallas import tpu as pltpu

LANE = 128
SUBLANE = 8
MAX_TILE_ROWS = 4096            # (4096, 128) f32 tile = 2 MiB per input stream
REDUCTION_PARTS = 2             # leading "parallel" axis: one part per TC on v7x
VMEM_LIMIT_BYTES = 32 * 1024 * 1024


def _cdiv(a, b):
    return -(-a // b)


def _round_up(x, m):
    return _cdiv(x, m) * m


def _cparams(dimension_semantics):
    return pltpu.CompilerParams(dimension_semantics=dimension_semantics,
                                vmem_limit_bytes=VMEM_LIMIT_BYTES)


def _sum_to_vreg(x):
    """(tile_rows, LANE) f32 -> (SUBLANE, LANE) via pure VPU tree adds."""
    return x.reshape(-1, SUBLANE, LANE).sum(axis=0)


# ---------------- reduction kernels (sum of |pred - target| [* weight]) --------------

def _l1_sum_kernel(pred_ref, tgt_ref, out_ref, *,
                   tile_rows, tiles_per_part, rows, needs_mask):
    c = pl.program_id(0)
    i = pl.program_id(1)

    @pl.when(i == 0)
    def _():
        out_ref[...] = jnp.zeros_like(out_ref)

    diff = jnp.abs(pred_ref[...].astype(jnp.float32) -
                   tgt_ref[...].astype(jnp.float32))
    if needs_mask:
        base = (c * tiles_per_part + i) * tile_rows
        row_ids = base + lax.broadcasted_iota(jnp.int32, diff.shape, 0)
        diff = jnp.where(row_ids < rows, diff, 0.0)

    out_ref[...] += _sum_to_vreg(diff)[None]


def _l1_sum_weighted_kernel(pred_ref, tgt_ref, w_ref, loss_ref, wsum_ref, *,
                            tile_rows, tiles_per_part, rows, needs_mask):
    # weight has the same shape as pred (channel dim == C).
    c = pl.program_id(0)
    i = pl.program_id(1)

    @pl.when(i == 0)
    def _():
        loss_ref[...] = jnp.zeros_like(loss_ref)
        wsum_ref[...] = jnp.zeros_like(wsum_ref)

    w = w_ref[...].astype(jnp.float32)
    diff = jnp.abs(pred_ref[...].astype(jnp.float32) -
                   tgt_ref[...].astype(jnp.float32))
    if needs_mask:
        base = (c * tiles_per_part + i) * tile_rows
        row_ids = base + lax.broadcasted_iota(jnp.int32, diff.shape, 0)
        valid = row_ids < rows
        diff = jnp.where(valid, diff, 0.0)
        w = jnp.where(valid, w, 0.0)

    loss_ref[...] += _sum_to_vreg(diff * w)[None]
    wsum_ref[...] += _sum_to_vreg(w)[None]


def _l1_sum_wbcast_kernel(pred_ref, tgt_ref, w_ref, loss_ref, wsum_ref, *,
                          hw_tile, r_rows, needs_mask):
    # weight has channel dim 1 and is streamed un-broadcast; its BlockSpec
    # drops the channel coordinate, so it contributes to wsum once per channel
    # (== sum of the broadcast weight, matching basicsr semantics).
    t = pl.program_id(1)
    c = pl.program_id(2)

    @pl.when((t == 0) & (c == 0))
    def _():
        loss_ref[...] = jnp.zeros_like(loss_ref)
        wsum_ref[...] = jnp.zeros_like(wsum_ref)

    p = pred_ref[0, 0].astype(jnp.float32)
    g = tgt_ref[0, 0].astype(jnp.float32)
    w = w_ref[0, 0].astype(jnp.float32)
    diff = jnp.abs(p - g)
    if needs_mask:
        row_ids = t * hw_tile + lax.broadcasted_iota(jnp.int32, diff.shape, 0)
        valid = row_ids < r_rows
        diff = jnp.where(valid, diff, 0.0)
        w = jnp.where(valid, w, 0.0)

    loss_ref[...] += _sum_to_vreg(diff * w)[None]
    wsum_ref[...] += _sum_to_vreg(w)[None]


# ---------------- elementwise kernels (reduction='none') -----------------------------

def _l1_elem_kernel(pred_ref, tgt_ref, out_ref):
    d = jnp.abs(pred_ref[...].astype(jnp.float32) -
                tgt_ref[...].astype(jnp.float32))
    out_ref[...] = d.astype(out_ref.dtype)


def _l1_elem_weighted_kernel(pred_ref, tgt_ref, w_ref, out_ref):
    d = jnp.abs(pred_ref[...].astype(jnp.float32) -
                tgt_ref[...].astype(jnp.float32))
    out_ref[...] = (d * w_ref[...].astype(jnp.float32)).astype(out_ref.dtype)


# ---------------- glue ----------------------------------------------------------------

def _flatten_lane_dense(x):
    """Flatten to (rows, LANE) with rows a multiple of SUBLANE.

    Only pads (a full HBM copy) when numel is not already a multiple of
    SUBLANE*LANE = 1024; typical NCHW image tensors hit the no-pad fast path.
    Padding is zero, so padded elements contribute 0 to all sums.
    """
    flat = x.reshape(-1)
    n = flat.shape[0]
    chunk = SUBLANE * LANE
    padded = _round_up(n, chunk)
    if padded != n:
        flat = jnp.pad(flat, (0, padded - n))
    return flat.reshape(padded // LANE, LANE), n


def _choose_sum_tile_rows(rows):
    # Grow tiles to amortize per-step overhead, but keep >= 2 tiles per
    # reduction part so both TensorCores stay busy on v7x.
    target = _round_up(_cdiv(rows, 2 * REDUCTION_PARTS), SUBLANE)
    return max(SUBLANE, min(MAX_TILE_ROWS, target, rows))


def _launch_sum_2d(pred2d, tgt2d, w2d=None):
    rows = pred2d.shape[0]                      # multiple of SUBLANE
    tile_rows = _choose_sum_tile_rows(rows)     # multiple of SUBLANE
    total_blocks = _cdiv(rows, tile_rows)
    parts = min(REDUCTION_PARTS, total_blocks)
    tiles_per_part = _cdiv(total_blocks, parts)
    needs_mask = (parts * tiles_per_part * tile_rows) != rows
    last_block = total_blocks - 1

    def in_map(c, i):
        blk = c * tiles_per_part + i
        if needs_mask:
            blk = jnp.minimum(blk, last_block)  # clamp fully-OOB blocks; masked in-kernel
        return (blk, 0)

    in_spec = pl.BlockSpec((tile_rows, LANE), in_map)
    out_spec = pl.BlockSpec((1, SUBLANE, LANE), lambda c, i: (c, 0, 0))
    cparams = _cparams(("parallel", "arbitrary"))

    if w2d is None:
        kern = functools.partial(
            _l1_sum_kernel, tile_rows=tile_rows, tiles_per_part=tiles_per_part,
            rows=rows, needs_mask=needs_mask)
        partials = pl.pallas_call(
            kern,
            out_shape=jax.ShapeDtypeStruct((parts, SUBLANE, LANE), jnp.float32),
            grid_spec=pltpu.PrefetchScalarGridSpec(
                num_scalar_prefetch=0,
                grid=(parts, tiles_per_part),
                in_specs=[in_spec, in_spec],
                out_specs=out_spec),
            compiler_params=cparams,
        )(pred2d, tgt2d)
        return jnp.sum(partials), None

    kern = functools.partial(
        _l1_sum_weighted_kernel, tile_rows=tile_rows,
        tiles_per_part=tiles_per_part, rows=rows, needs_mask=needs_mask)
    loss_p, w_p = pl.pallas_call(
        kern,
        out_shape=(jax.ShapeDtypeStruct((parts, SUBLANE, LANE), jnp.float32),
                   jax.ShapeDtypeStruct((parts, SUBLANE, LANE), jnp.float32)),
        grid_spec=pltpu.PrefetchScalarGridSpec(
            num_scalar_prefetch=0,
            grid=(parts, tiles_per_part),
            in_specs=[in_spec, in_spec, in_spec],
            out_specs=[out_spec, out_spec]),
        compiler_params=cparams,
    )(pred2d, tgt2d, w2d)
    return jnp.sum(loss_p), jnp.sum(w_p)


def _launch_sum_weighted_nobcast(pred, target, weight):
    """Weighted sum for weight of shape (N, 1, *spatial) without broadcasting it."""
    N, C = pred.shape[0], pred.shape[1]
    hw = math.prod(pred.shape[2:])
    chunk = SUBLANE * LANE
    hw_pad = _round_up(hw, chunk)

    def to4(x, ch):
        x3 = x.reshape(x.shape[0], ch, hw)
        if hw_pad != hw:
            x3 = jnp.pad(x3, ((0, 0), (0, 0), (0, hw_pad - hw)))
        return x3.reshape(x.shape[0], ch, hw_pad // LANE, LANE)

    p4 = to4(pred, C)
    t4 = to4(target, C)
    w4 = to4(weight, 1)

    r_rows = hw_pad // LANE                    # multiple of SUBLANE
    hw_tile = min(MAX_TILE_ROWS, r_rows)       # multiple of SUBLANE
    n_tiles = _cdiv(r_rows, hw_tile)
    needs_mask = (n_tiles * hw_tile) != r_rows

    # c is the innermost grid axis: the weight block index is c-independent, so
    # consecutive steps reuse the same resident weight tile (no re-DMA).
    data_spec = pl.BlockSpec((1, 1, hw_tile, LANE), lambda n, t, c: (n, c, t, 0))
    w_spec = pl.BlockSpec((1, 1, hw_tile, LANE), lambda n, t, c: (n, 0, t, 0))
    out_spec = pl.BlockSpec((1, SUBLANE, LANE), lambda n, t, c: (n, 0, 0))

    kern = functools.partial(_l1_sum_wbcast_kernel, hw_tile=hw_tile,
                             r_rows=r_rows, needs_mask=needs_mask)
    loss_p, w_p = pl.pallas_call(
        kern,
        out_shape=(jax.ShapeDtypeStruct((N, SUBLANE, LANE), jnp.float32),
                   jax.ShapeDtypeStruct((N, SUBLANE, LANE), jnp.float32)),
        grid_spec=pltpu.PrefetchScalarGridSpec(
            num_scalar_prefetch=0,
            grid=(N, n_tiles, C),
            in_specs=[data_spec, data_spec, w_spec],
            out_specs=[out_spec, out_spec]),
        compiler_params=_cparams(("parallel", "arbitrary", "arbitrary")),
    )(p4, t4, w4)
    return jnp.sum(loss_p), jnp.sum(w_p)


def _launch_elem(pred2d, tgt2d, out_dtype, w2d=None):
    rows = pred2d.shape[0]
    tile_rows = min(MAX_TILE_ROWS, rows)
    total_blocks = _cdiv(rows, tile_rows)
    spec = pl.BlockSpec((tile_rows, LANE), lambda i: (i, 0))
    cparams = _cparams(("parallel",))
    out_shape = jax.ShapeDtypeStruct(pred2d.shape, out_dtype)

    if w2d is None:
        return pl.pallas_call(
            _l1_elem_kernel, out_shape=out_shape,
            grid_spec=pltpu.PrefetchScalarGridSpec(
                num_scalar_prefetch=0, grid=(total_blocks,),
                in_specs=[spec, spec], out_specs=spec),
            compiler_params=cparams,
        )(pred2d, tgt2d)
    return pl.pallas_call(
        _l1_elem_weighted_kernel, out_shape=out_shape,
        grid_spec=pltpu.PrefetchScalarGridSpec(
            num_scalar_prefetch=0, grid=(total_blocks,),
            in_specs=[spec, spec, spec], out_specs=spec),
        compiler_params=cparams,
    )(pred2d, tgt2d, w2d)


def l1_loss_pallas(pred, target, weight=None, loss_weight=1.0, reduction="mean"):
    """Matches basicsr L1Loss.forward (weighted_loss + weight_reduce_loss) semantics."""
    if reduction not in ("none", "mean", "sum"):
        raise ValueError(f"Unsupported reduction mode: {reduction}")

    orig_shape = pred.shape
    orig_dtype = pred.dtype
    n_valid = math.prod(orig_shape)

    if weight is not None:
        # basicsr contract: weight.dim() == loss.dim(), weight channel dim is 1 or C.
        if weight.ndim != pred.ndim:
            raise ValueError("weight must have the same number of dims as pred")
        if pred.ndim >= 2 and weight.shape[1] not in (1, pred.shape[1]):
            raise ValueError("weight channel dim must be 1 or match pred")

    if reduction == "none":
        # TODO(synk): stream (N,1,H,W) weights un-broadcast in the elementwise
        # path too (output write dominates here, so the gain is smaller).
        w_full = jnp.broadcast_to(weight, orig_shape) if weight is not None else None
        pred2d, n = _flatten_lane_dense(pred)
        tgt2d, _ = _flatten_lane_dense(target)
        w2d = _flatten_lane_dense(w_full)[0] if w_full is not None else None
        out2d = _launch_elem(pred2d, tgt2d, orig_dtype, w2d)
        out = out2d.reshape(-1)[:n].reshape(orig_shape)
        return loss_weight * out

    # 'mean' / 'sum'
    if weight is None:
        pred2d, _ = _flatten_lane_dense(pred)
        tgt2d, _ = _flatten_lane_dense(target)
        loss_sum, w_sum = _launch_sum_2d(pred2d, tgt2d, None)
    elif (pred.ndim >= 3 and weight.shape[0] == pred.shape[0]
          and weight.shape[1] == 1 and weight.shape[2:] == pred.shape[2:]):
        # (N,1,H,W)-style weight: stream it un-broadcast (no pred-sized copy).
        loss_sum, w_sum = _launch_sum_weighted_nobcast(pred, target, weight)
    else:
        # Same-shape weight (or other broadcastable shapes): third input stream.
        w_full = weight if weight.shape == orig_shape else jnp.broadcast_to(weight, orig_shape)
        pred2d, _ = _flatten_lane_dense(pred)
        tgt2d, _ = _flatten_lane_dense(target)
        w2d, _ = _flatten_lane_dense(w_full)
        loss_sum, w_sum = _launch_sum_2d(pred2d, tgt2d, w2d)

    if reduction == "sum":
        result = loss_sum
    elif weight is None:
        result = loss_sum / jnp.float32(n_valid)
    else:
        # basicsr weighted mean: loss.sum() / broadcast_weight.sum()
        # (covers both weight.size(1)==1 and ==C cases).
        result = loss_sum / (w_sum + jnp.float32(1e-12))

    return (jnp.float32(loss_weight) * result).astype(orig_dtype)


if __name__ == "__main__":
    key = jax.random.PRNGKey(0)
    k1, k2, k3, k4 = jax.random.split(key, 4)
    # (N, C, H, W) as in the PyTorch module
    pred = jax.random.normal(k1, (2, 4, 16, 16), dtype=jnp.float32)
    target = jax.random.normal(k2, (2, 4, 16, 16), dtype=jnp.float32)
    weight1 = jax.random.uniform(k3, (2, 1, 16, 16), dtype=jnp.float32)   # channel dim 1
    weightC = jax.random.uniform(k4, (2, 4, 16, 16), dtype=jnp.float32)   # full shape

    # mean (default module config)
    loss_mean = jax.block_until_ready(
        l1_loss_pallas(pred, target, weight=None, loss_weight=1.0, reduction="mean"))
    ref_mean = jnp.mean(jnp.abs(pred - target))
    assert jnp.allclose(loss_mean, ref_mean, rtol=1e-5, atol=1e-6), (loss_mean, ref_mean)

    # sum
    loss_sum = jax.block_until_ready(l1_loss_pallas(pred, target, reduction="sum"))
    ref_sum = jnp.sum(jnp.abs(pred - target))
    assert jnp.allclose(loss_sum, ref_sum, rtol=1e-5, atol=1e-4), (loss_sum, ref_sum)

    # none
    loss_none = jax.block_until_ready(l1_loss_pallas(pred, target, reduction="none"))
    ref_none = jnp.abs(pred - target)
    assert jnp.allclose(loss_none, ref_none, rtol=1e-5, atol=1e-6)

    # weighted mean, (N,1,H,W) weight (basicsr: loss.sum() / broadcast_weight.sum())
    loss_wm = jax.block_until_ready(
        l1_loss_pallas(pred, target, weight=weight1, reduction="mean"))
    w_b = jnp.broadcast_to(weight1, pred.shape)
    ref_wm = jnp.sum(jnp.abs(pred - target) * w_b) / (jnp.sum(w_b) + 1e-12)
    assert jnp.allclose(loss_wm, ref_wm, rtol=1e-5, atol=1e-6), (loss_wm, ref_wm)

    # weighted mean, full-shape weight
    loss_wmC = jax.block_until_ready(
        l1_loss_pallas(pred, target, weight=weightC, reduction="mean"))
    ref_wmC = jnp.sum(jnp.abs(pred - target) * weightC) / (jnp.sum(weightC) + 1e-12)
    assert jnp.allclose(loss_wmC, ref_wmC, rtol=1e-5, atol=1e-6), (loss_wmC, ref_wmC)

    # weighted sum, (N,1,H,W) weight
    loss_ws = jax.block_until_ready(
        l1_loss_pallas(pred, target, weight=weight1, reduction="sum"))
    ref_ws = jnp.sum(jnp.abs(pred - target) * w_b)
    assert jnp.allclose(loss_ws, ref_ws, rtol=1e-5, atol=1e-4), (loss_ws, ref_ws)

    # weighted none
    loss_wn = jax.block_until_ready(
        l1_loss_pallas(pred, target, weight=weight1, reduction="none"))
    ref_wn = jnp.abs(pred - target) * w_b
    assert jnp.allclose(loss_wn, ref_wn, rtol=1e-5, atol=1e-6)

    print("KERNEL_OK")
</pallas_src>

<mosaic_0001>
module attributes {stable_mosaic.version = 11 : i64} {
  func.func @_l1_sum_kernel(%arg0: i32, %arg1: i32, %arg2: memref<8x128xf32, #tpu.memory_space<vmem>>, %arg3: memref<8x128xf32, #tpu.memory_space<vmem>>, %arg4: memref<1x8x128xf32, #tpu.memory_space<vmem>>) attributes {dimension_semantics = [#tpu.dimension_semantics<parallel>, #tpu.dimension_semantics<arbitrary>], iteration_bounds = array<i64: 2, 1>, scalar_prefetch = 0 : i64, scratch_operands = 0 : i64, tpu.core_type = #tpu.core_type<tc>, window_params = [{transform_indices = @transform_0, window_bounds = array<i64: 8, 128>}, {transform_indices = @transform_1, window_bounds = array<i64: 8, 128>}, {transform_indices = @transform_2, window_bounds = array<i64: 1, 8, 128>}]} {
    %c0_i32 = arith.constant 0 : i32
    %0 = arith.cmpi eq, %arg1, %c0_i32 : i32
    %1 = arith.extui %0 : i1 to i32
    %c0_i32_0 = arith.constant 0 : i32
    %2 = arith.cmpi ne, %1, %c0_i32_0 : i32
    scf.if %2 {
      %cst_10 = arith.constant 0.000000e+00 : f32
      %13 = vector.broadcast %cst_10 : f32 to vector<1x8x128xf32>
      %c0_11 = arith.constant 0 : index
      %c0_12 = arith.constant 0 : index
      %c0_13 = arith.constant 0 : index
      %14 = vector.load %arg4[%c0_11, %c0_12, %c0_13] : memref<1x8x128xf32, #tpu.memory_space<vmem>>, vector<1x8x128xf32>
      tpu.vector_store %arg4[%c0_11, %c0_12, %c0_13], %13 {strides = array<i32>} : memref<1x8x128xf32, #tpu.memory_space<vmem>>, vector<1x8x128xf32>,
    } else {
    }
    %c0 = arith.constant 0 : index
    %c0_1 = arith.constant 0 : index
    %3 = vector.load %arg2[%c0, %c0_1] : memref<8x128xf32, #tpu.memory_space<vmem>>, vector<8x128xf32>
    %c0_2 = arith.constant 0 : index
    %c0_3 = arith.constant 0 : index
    %4 = vector.load %arg3[%c0_2, %c0_3] : memref<8x128xf32, #tpu.memory_space<vmem>>, vector<8x128xf32>
    %5 = arith.subf %3, %4 : vector<8x128xf32>
    %6 = math.absf %5 : vector<8x128xf32>
    %c0_4 = arith.constant 0 : index
    %c0_5 = arith.constant 0 : index
    %c0_6 = arith.constant 0 : index
    %7 = vector.load %arg4[%c0_4, %c0_5, %c0_6] : memref<1x8x128xf32, #tpu.memory_space<vmem>>, vector<1x8x128xf32>
    %8 = vector.shape_cast %6 : vector<8x128xf32> to vector<1x8x128xf32>
    %cst = arith.constant dense<0.000000e+00> : vector<8x128xf32>
    %9 = vector.multi_reduction <add>, %8, %cst [0] : vector<1x8x128xf32> to vector<8x128xf32>
    %10 = vector.shape_cast %9 : vector<8x128xf32> to vector<1x8x128xf32>
    %11 = arith.addf %7, %10 : vector<1x8x128xf32>
    %c0_7 = arith.constant 0 : index
    %c0_8 = arith.constant 0 : index
    %c0_9 = arith.constant 0 : index
    %12 = vector.load %arg4[%c0_7, %c0_8, %c0_9] : memref<1x8x128xf32, #tpu.memory_space<vmem>>, vector<1x8x128xf32>
    tpu.vector_store %arg4[%c0_7, %c0_8, %c0_9], %11 {strides = array<i32>} : memref<1x8x128xf32, #tpu.memory_space<vmem>>, vector<1x8x128xf32>,
    return
  }
  func.func @transform_0(%arg0: i32, %arg1: i32) -> (i32, i32) {
    %c1_i32 = arith.constant 1 : i32
    %0 = arith.muli %arg0, %c1_i32 : i32
    %1 = arith.addi %0, %arg1 : i32
    %c0_i32 = arith.constant 0 : i32
    %c0_i32_0 = arith.constant 0 : i32
    return %1, %c0_i32 : i32, i32
  }
  func.func @transform_1(%arg0: i32, %arg1: i32) -> (i32, i32) {
    %c1_i32 = arith.constant 1 : i32
    %0 = arith.muli %arg0, %c1_i32 : i32
    %1 = arith.addi %0, %arg1 : i32
    %c0_i32 = arith.constant 0 : i32
    %c0_i32_0 = arith.constant 0 : i32
    return %1, %c0_i32 : i32, i32
  }
  func.func @transform_2(%arg0: i32, %arg1: i32) -> (i32, i32, i32) {
    %c0_i32 = arith.constant 0 : i32
    %c0_i32_0 = arith.constant 0 : i32
    %c0_i32_1 = arith.constant 0 : i32
    return %arg0, %c0_i32, %c0_i32_0 : i32, i32, i32
  }
}

</mosaic_0001>

<bundles_post_ra>
// kernel: tpu_custom_call.1
= control target key start
LH: loop header
LB: loop body
LE: loop exit
PB: predicated region body
PF: predicated region fallthrough
CT: control target
= control target key end

     0   :  { %7 = vsyncpa [#allocation3], 0  ;;  %s727_s0 = inlined_call_operand.hbm [shape: f32[16,128], index: 0, kind: input, shape index: {}]   ;;  %s728_s1 = inlined_call_operand.hbm [shape: f32[16,128], index: 1, kind: input, shape index: {}]   ;;  %s729_s2 = inlined_call_operand.hbm [shape: f32[2,8,128], index: 2, kind: output, shape index: {}]  }
   0x1   :  { %9 = vsyncpa [#allocation3 + $0x1], 0 }
   0x2   :  { %10 = vsyncpa [#allocation6], 0 }
   0x3   :  { %12 = vsyncpa [#allocation6 + $0x1], 0 }
   0x4   :  { %13 = vsyncpa [#allocation4], 0 }
   0x5   :  { %15 = vsyncpa [#allocation4 + $0x1], 0  ;;  %s599_s9 = smov 0   ;;  %s601_s10 = smov 0  }
   0x6   :  { %s603_s11 = smov 0   ;;  %s605_s12 = smov 0  }
   0x7   :  { %s607_s13 = smov 0   ;;  %s609_s14 = smov 0  }
   0x8 LB: > { %s352_s15 = sadd.s32 4294967295, %s582_s14   ;;  %s353_s16 = sadd.s32 4294967294, %s582_s14   ;;  %s582_s14 = sphi %s609_s14, %s21_s14   ;;  %s578_s13 = sphi %s607_s13, %s738_s13   ;;  %s574_s12 = sphi %s605_s12, %s737_s12   ;;  %s570_s11 = sphi %s603_s11, %s736_s11   ;;  %s566_s10 = sphi %s601_s10, %s735_s10   ;;  %s562_s9 = sphi %s599_s9, %s734_s9  }
   0x9   : > { %s33_s17 = sadd.s32 1, %s578_s13  ;;  %s42_s18 = sadd.s32 1, %s570_s11 }
   0xa   : > { %p35_p0 = scmp.ge.s32.totalorder %s33_s17, 2  ;;  %p49_p1 = scmp.ne.s32.totalorder %s570_s11, %s566_s10 }
   0xb   : > { %p50_p2 = scmp.eq.s32.totalorder %s582_s14, 0  ;;  %p55_p3 = scmp.ne.s32.totalorder %s566_s10, %s562_s9 }
   0xc   : > { %s740_s17 = smov (%p35_p0, %s33_s17), 0  ;;  %p56_p5 = scmp.eq.s32.totalorder %s352_s15, 0 }
   0xd   : > { %p640_p4 = por %p50_p2, %p49_p1  ;;  %s39_s20 = ssub.s32 %s578_s13, %s740_s17 }
   0xe   : > { %p107_p6 = scmp.eq.s32.totalorder %s352_s15, 1  ;;  %p40_p7 = scmp.eq.s32.totalorder %s39_s20, 0 }
   0xf   : > { %p646_p8 = por %p56_p5, %p55_p3  ;;  %p113_p10 = scmp.eq.s32.totalorder %s353_s16, 1 }
  0x10   : > { %p650_p9 = por %p107_p6, %p49_p1  ;;  %p355_p12 = scmp.ge.s32.totalorder %s582_s14, 2 }
  0x11   : > { %s655_s23 = scalar_select %p40_p7, %s570_s11, %s42_s18  }
  0x12   : > { %p657_p11 = por %p113_p10, %p55_p3  ;;  %p385_p13 = scmp.lt.s32.totalorder %s582_s14, 2 }
  0x13   : > { %s133_s25 = sand.u32 1, %s570_s11   ;;  %s357_s27 = sshll.u32 %s578_s13, 3 }
  0x14   : > { %s356_s26 = sshll.u32 %s133_s25, 3  ;;  %s142_s30 = scalar_lea.hbm %s727_s0, %s357_s27 }
  0x15   : > { %s137_s3 = scalar_lea.vmem [#allocation2], %s356_s26  ;;  %s144_s5 = sshll.u32 %s142_s30, 4  ;;  %s145_s5 = int_to_ptr.hbm [resolvable:$true] %s144_s5 }
  0x16   : > { %s146_s4 = sshll.u32 %s137_s3, 4  ;;  %p375_p0 = pnand %p385_p13, %p640_p4  ;;  %s147_s4 = int_to_ptr.vmem [resolvable:$true] %s146_s4 }
  0x17   : > { %p360_p1 = scmp.ge.s32.totalorder %s582_s14, 1  ;;  %p171_p2 = scmp.lt.s32.totalorder %s582_s14, 3 }
  0x18   : > { %s134_s6 = scalar_lea.sflag [#allocation3], %s133_s25  ;;  %s162_s15 = scalar_lea.hbm %s728_s1, %s357_s27 }
  0x19   : > { %377 = dma.hbm_to_vmem [thread:$0]  (!%p375_p0), %s145_s5, 128, %s147_s4, %s134_s6  }
  0x1a   : > { %p172_p3 = pnand %p360_p1, %p171_p2  ;;  %s157_s16 = scalar_lea.vmem [#allocation5], %s356_s26 }
  0x1b   : > { %s166_s18 = sshll.u32 %s157_s16, 4  ;;  %s164_s20 = sshll.u32 %s162_s15, 4  ;;  %s167_s18 = int_to_ptr.vmem [resolvable:$true] %s166_s18  ;;  %s165_s20 = int_to_ptr.hbm [resolvable:$true] %s164_s20 }
  0x1c   : > { %s154_s28 = scalar_lea.sflag [#allocation6], %s133_s25  ;;  %175 = sbr.rel (%p172_p3) target bundleno = 51 (0x33), region = 28 }
  0x1d   : > { %380 = dma.hbm_to_vmem [thread:$0]  (!%p375_p0), %s165_s20, 128, %s167_s18, %s154_s28  }
  0x1e   : > { %s676_s19 = sand.u32 (!%p172_p3), 1, %s566_s10  }
  0x1f   : > { %s361_s29 = sshll.u32 (!%p172_p3), %s676_s19, 3  ;;  %s178_s30 = scalar_lea.sflag (!%p172_p3), [#allocation3], %s676_s19 }
  0x20   : > { %s181_s3 = scalar_lea.vmem (!%p172_p3), [#allocation2], %s361_s29 }
  0x21   : > { %549 = dma.done.wait (%p646_p8), %s178_s30, 128  }
  0x22   : > { %551 = vsyncadd (%p646_p8), %s178_s30, 4294967168  ;;  %s188_s26 = scalar_lea.sflag [#allocation6], %s676_s19  ;;  %s191_s25 = scalar_lea.vmem [#allocation5], %s361_s29 }
  0x23   : > { %553 = dma.done.wait (%p646_p8), %s188_s26, 128  }
  0x24   : > { %555 = vsyncadd (%p646_p8), %s188_s26, 4294967168  ;;  %s365_s27 = sshll.u32 %s574_s12, 3  ;;  %v225_v0 = vld [vmem:[%s181_s3] sm:$0xff]  ;;  %v226_v1 = vld [vmem:[%s191_s25] sm:$0xff]  ;;  %s217_s7 = scalar_lea.vmem [#allocation7], %s361_s29 }
  0x25   : > { %s244_s6 = scalar_lea.hbm %s729_s2, %s365_s27  ;;  %v227_v2 = vsub.f32 %v225_v0, %v226_v1  ;;  %s246_s8 = sshll.u32 %s217_s7, 4  ;;  %s247_s8 = int_to_ptr.vmem [resolvable:$true] %s246_s8 }
  0x26   : > { %s248_s15 = sshll.u32 %s244_s6, 4  ;;  %s234_s21 = scalar_lea.sflag [#allocation4], %s676_s19  ;;  %s249_s15 = int_to_ptr.hbm [resolvable:$true] %s248_s15 }
  0x27   : > { %v228_v3 = vand.u32 2147483647, %v227_v2  ;;  %s510_s16 = sshra.s32 %s249_s15, 4  ;;  %s516_s28 = scalar_lea.hbm %s729_s2, 16  ;;  %s511_s16 = int_to_ptr.hbm [resolvable:$true] %s510_s16 }
  0x28   : > { %s512_s18 = scalar_lea.hbm %s511_s16, 8  ;;  %p517_p7 = scmp.lt.s32.totalorder %s511_s16, %s729_s2 }
  0x29   : > { %232 = vst [vmem:[%s217_s7] sm:$0xff] %v228_v3  ;;  %p513_p4 = scmp.ne.s32.totalorder %s511_s16, %s512_s18  ;;  %p518_p8 = scmp.lt.s32.totalorder %s516_s28, %s512_s18 }
  0x2b   : > { %p514_p5 = pnand %p513_p4, %p650_p9  ;;  %p519_p10 = por %p518_p8, %p517_p7 }
  0x2d   : > { %p515_p6 = pneg %p514_p5 }
  0x2f   : > { %p520_p13 = pnand %p519_p10, %p515_p6 }
  0x31   : > { %523 = shalt.err (!%p520_p13)
}
  0x32   : > { %372 = dma.vmem_to_hbm [thread:$0]  (%p650_p9), %s247_s8, 128, %s249_s15, %s234_s21  }
  0x33 PF: > { %s260_s19 = sand.u32 1, %s562_s9   ;;  %p382_p0 = pnand %p355_p12, %p657_p11 }
  0x34   : > { %s261_s3 = scalar_lea.sflag [#allocation4], %s260_s19 }
  0x35   : > { %p383_p1 = pneg %p382_p0 }
  0x37   : > { %557 = dma.done.wait (%p383_p1), %s261_s3, 128  }
  0x38   : > { %559 = vsyncadd (%p383_p1), %s261_s3, 4294967168  ;;  %s21_s14 = sadd.s32 1, %s582_s14   ;;  %s734_s9 = smov %s566_s10 }
  0x39   : > { %p18_p2 = scmp.ge.s32.totalorder %s21_s14, 4   ;;  %s735_s10 = smov %s570_s11 }
  0x3a   : > { %s736_s11 = smov %s655_s23  ;;  %s737_s12 = smov %s578_s13 }
  0x3b   : > { %s738_s13 = smov %s740_s17  ;;  %20 = sbr.rel (!%p18_p2) target bundleno = 8 (0x8), region = 90 }
  0x40   :  { %267 = vsyncpa [#allocation3], 1 }
  0x41   :  { %269 = vsyncpa [#allocation3 + $0x1], 1 }
  0x42   :  { %270 = vsyncpa [#allocation6], 1 }
  0x43   :  { %272 = vsyncpa [#allocation6 + $0x1], 1 }
  0x44   :  { %273 = vsyncpa [#allocation4], 1 }
  0x45   :  { %275 = vsyncpa [#allocation4 + $0x1], 1 }

</bundles_post_ra>
